<compile_context>
chip_gen: v6e
topology: v6e:2x2x1
jax: 0.10.0
libtpu: 0.0.40
codegen_flags: <defaults>
</compile_context>

<pallas_src>
import functools

import jax
import jax.numpy as jnp
from jax import lax
from jax.experimental import pallas as pl
from jax.experimental.pallas import tpu as pltpu


_TARGET_TILE_BYTES = 4 * 1024 * 1024   # input bytes moved per grid step
_MAX_BLOCK_ROWS = 2048                 # bounds f32 scratch to 3 x 1 MiB
_MAX_BLOCK_T = 4096
_MAX_BLOCK_T_SMALL_ROWS = 8192


def _round_up(a, m):
    return ((a + m - 1) // m) * m


def _choose_tiles(rows, t, itemsize, block_rows=None, block_t=None):
    """Pick (row block, time block, chunk width) for a ~4 MiB per-step tile."""
    rows8 = _round_up(rows, 8)
    tk_full = t if t <= 128 else _round_up(t, 128)

    if block_t is not None:
        tk = block_t
    elif t <= 128:
        tk = t
    else:
        tk = min(tk_full, _MAX_BLOCK_T)
        rows_at_budget = _TARGET_TILE_BYTES // max(1, tk * itemsize)
        if rows_at_budget >= rows8 and tk < tk_full:
            # Few rows: grow the time tile instead so each grid step still
            # moves a multi-MiB slab (per-step pipeline overhead ~0.35 us).
            tk = _TARGET_TILE_BYTES // max(1, rows8 * itemsize)
            tk = max(128, (tk // 128) * 128)
            tk = min(tk, tk_full, _MAX_BLOCK_T_SMALL_ROWS)

    cw = min(tk, 128)   # lane-chunk width used for the in-register streaming

    if block_rows is not None:
        bm = block_rows
    else:
        bm = _TARGET_TILE_BYTES // max(1, tk * itemsize)
        bm = max(8, (bm // 8) * 8)
        bm = min(bm, _MAX_BLOCK_ROWS, rows8)
        # v7x megacore: keep >= 2 blocks on the parallel row axis when the
        # problem is big enough to split (v5e/v6e are single-TC, unaffected).
        if rows > 8 and bm >= rows8:
            bm = max(8, _round_up((rows + 1) // 2, 8))
    return bm, tk, cw


def _stat_pool_kernel(x_ref, shift_out_ref, s1_out_ref, s2_out_ref,
                      shift_ref, s1_ref, s2_ref,
                      *, t_total, tk, cw, nchunk, rsub, ragged):
    """One (bm, tk) tile: accumulate shifted lane-partial S1/S2; reduce at the end."""
    k = pl.program_id(1)
    nk = pl.num_programs(1)
    bm = s1_ref.shape[0]

    @pl.when(k == 0)
    def _init():
        s1_ref[...] = jnp.zeros(s1_ref.shape, jnp.float32)
        s2_ref[...] = jnp.zeros(s2_ref.shape, jnp.float32)
        # Per-row shift = mean of the first time chunk, stored lane-replicated
        # so the steady-state subtraction is a plain elementwise VPU op.
        for r0 in range(0, bm, rsub):
            rh = min(rsub, bm - r0)
            rs = slice(r0, r0 + rh)
            x0 = x_ref[rs, 0:cw].astype(jnp.float32)
            if t_total < cw:  # only possible with an explicit block_t override
                valid0 = lax.broadcasted_iota(jnp.int32, (1, cw), 1) < t_total
                x0 = jnp.where(valid0, x0, jnp.float32(0.0))
                sh = jnp.sum(x0, axis=-1, keepdims=True) / jnp.float32(t_total)
            else:
                sh = jnp.mean(x0, axis=-1, keepdims=True)
            shift_ref[rs, :] = jnp.broadcast_to(sh, (rh, cw))

    def accumulate(masked):
        for c in range(nchunk):
            cs = slice(c * cw, (c + 1) * cw)
            if masked:
                t_idx = (k * tk + c * cw
                         + lax.broadcasted_iota(jnp.int32, (1, cw), 1))
                valid = t_idx < t_total
            for r0 in range(0, bm, rsub):
                rh = min(rsub, bm - r0)
                rs = slice(r0, r0 + rh)
                xc = x_ref[rs, cs].astype(jnp.float32) - shift_ref[rs, :]
                if masked:
                    xc = jnp.where(valid, xc, jnp.float32(0.0))
                # Lane-preserving accumulation: pure elementwise VPU, no XLU.
                s1_ref[rs, :] = s1_ref[rs, :] + xc
                s2_ref[rs, :] = s2_ref[rs, :] + xc * xc

    if ragged:
        # Ragged T: pay for the mask only on the last reduction step.
        @pl.when(k < nk - 1)
        def _steady():
            accumulate(False)

        @pl.when(k == nk - 1)
        def _tail():
            accumulate(True)
    else:
        accumulate(False)

    @pl.when(k == nk - 1)
    def _finalize():
        # Single deferred cross-lane (XLU) reduce per row block.
        s1_out_ref[...] = jnp.sum(s1_ref[...], axis=-1, keepdims=True)
        s2_out_ref[...] = jnp.sum(s2_ref[...], axis=-1, keepdims=True)
        shift_out_ref[...] = shift_ref[:, 0:1]


@functools.partial(jax.jit, static_argnames=("block_rows", "block_t"))
def statistic_pooling(x, *, block_rows=None, block_t=None):
    """x: (N, C, T) -> (N, 2*C) = concat(mean over T, unbiased std over T)."""
    n, c, t = x.shape
    rows = n * c
    x2d = x.reshape(rows, t)  # free: contiguous, guarantees full sublane packing

    itemsize = jnp.dtype(x.dtype).itemsize
    bm, tk, cw = _choose_tiles(rows, t, itemsize, block_rows, block_t)
    nchunk = tk // cw
    rsub = min(64, bm)              # row sub-block: bounds per-statement vreg pressure
    ragged = (t % tk) != 0
    grid = (pl.cdiv(rows, bm), pl.cdiv(t, tk))

    kernel = functools.partial(
        _stat_pool_kernel, t_total=t, tk=tk, cw=cw,
        nchunk=nchunk, rsub=rsub, ragged=ragged)

    out_sd = jax.ShapeDtypeStruct((rows, 1), jnp.float32)
    shift, s1, s2 = pl.pallas_call(
        kernel,
        out_shape=(out_sd, out_sd, out_sd),
        grid_spec=pltpu.PrefetchScalarGridSpec(
            num_scalar_prefetch=0,
            grid=grid,
            in_specs=[
                pl.BlockSpec((bm, tk), lambda i, k: (i, k)),
            ],
            out_specs=[
                pl.BlockSpec((bm, 1), lambda i, k: (i, 0)),
                pl.BlockSpec((bm, 1), lambda i, k: (i, 0)),
                pl.BlockSpec((bm, 1), lambda i, k: (i, 0)),
            ],
            scratch_shapes=[
                pltpu.VMEM((bm, cw), jnp.float32),  # lane-replicated per-row shift
                pltpu.VMEM((bm, cw), jnp.float32),  # S1 lane-partials
                pltpu.VMEM((bm, cw), jnp.float32),  # S2 lane-partials
            ],
        ),
        compiler_params=pltpu.CompilerParams(
            dimension_semantics=("parallel", "arbitrary"),
            vmem_limit_bytes=32 * 1024 * 1024,  # explicit; safe on v7x (64 MiB VMEM)
        ),
    )(x2d)

    # Tiny finalize math on (rows, 1) arrays — cheap XLA, keeps the kernel lean.
    tf = jnp.float32(t)
    mean = shift + s1 / tf
    # Unbiased (ddof=1) variance from shifted sums. T == 1 gives 0/0 -> NaN,
    # matching torch.std of a single sample.
    var = (s2 - s1 * s1 / tf) / jnp.float32(t - 1)
    std = jnp.sqrt(jnp.maximum(var, jnp.float32(0.0)))

    mean = mean.reshape(n, c).astype(x.dtype)
    std = std.reshape(n, c).astype(x.dtype)
    return jnp.concatenate([mean, std], axis=1)


def _reference(x):
    mean_ref = jnp.mean(x, axis=2)
    std_ref = jnp.std(x, axis=2, ddof=1)
    return jnp.concatenate([mean_ref, std_ref], axis=1)


if __name__ == "__main__":
    key = jax.random.PRNGKey(0)
    k1, k2, k3 = jax.random.split(key, 3)

    # Shape implied by the module: (batch, channels, time) = (2, 4, 16).
    x1 = jax.random.normal(k1, (2, 4, 16), dtype=jnp.float32)
    out1 = jax.block_until_ready(statistic_pooling(x1))
    ref1 = _reference(x1)
    assert out1.shape == (2, 8), out1.shape
    assert jnp.allclose(out1, ref1, atol=1e-5, rtol=1e-5)

    # Multi-step T grid, ragged last T tile, 2 blocks on the parallel row axis.
    x2 = jax.random.normal(k2, (4, 8, 300), dtype=jnp.float32)
    out2 = jax.block_until_ready(statistic_pooling(x2, block_t=128))
    ref2 = _reference(x2)
    assert out2.shape == (4, 16), out2.shape
    assert jnp.allclose(out2, ref2, atol=1e-5, rtol=1e-5)

    # Multi-chunk time tile + non-zero-mean data (exercises the shifted
    # single-pass variance numerics and the per-chunk ragged mask).
    x3 = 100.0 + 0.1 * jax.random.normal(k3, (2, 12, 700), dtype=jnp.float32)
    out3 = jax.block_until_ready(statistic_pooling(x3))
    ref3 = _reference(x3)
    assert out3.shape == (2, 24), out3.shape
    assert jnp.allclose(out3, ref3, atol=1e-4, rtol=1e-5)

    print("KERNEL_OK")
</pallas_src>

<mosaic_0001>
module attributes {stable_mosaic.version = 11 : i64} {
  func.func @_stat_pool_kernel(%arg0: i32, %arg1: i32, %arg2: memref<8x16xf32, #tpu.memory_space<vmem>>, %arg3: memref<8x1xf32, #tpu.memory_space<vmem>>, %arg4: memref<8x1xf32, #tpu.memory_space<vmem>>, %arg5: memref<8x1xf32, #tpu.memory_space<vmem>>, %arg6: memref<8x16xf32, #tpu.memory_space<vmem>>, %arg7: memref<8x16xf32, #tpu.memory_space<vmem>>, %arg8: memref<8x16xf32, #tpu.memory_space<vmem>>) attributes {dimension_semantics = [#tpu.dimension_semantics<parallel>, #tpu.dimension_semantics<arbitrary>], iteration_bounds = array<i64: 1, 1>, scalar_prefetch = 0 : i64, scratch_operands = 3 : i64, tpu.core_type = #tpu.core_type<tc>, window_params = [{transform_indices = @transform_0, window_bounds = array<i64: 8, 16>}, {transform_indices = @transform_1, window_bounds = array<i64: 8, 1>}, {transform_indices = @transform_2, window_bounds = array<i64: 8, 1>}, {transform_indices = @transform_3, window_bounds = array<i64: 8, 1>}]} {
    %c0_i32 = arith.constant 0 : i32
    %0 = arith.cmpi eq, %arg1, %c0_i32 : i32
    %1 = arith.extui %0 : i1 to i32
    %c0_i32_0 = arith.constant 0 : i32
    %2 = arith.cmpi ne, %1, %c0_i32_0 : i32
    scf.if %2 {
      %cst = arith.constant 0.000000e+00 : f32
      %16 = vector.broadcast %cst : f32 to vector<8x16xf32>
      %c0_14 = arith.constant 0 : index
      %c0_15 = arith.constant 0 : index
      %17 = vector.load %arg7[%c0_14, %c0_15] : memref<8x16xf32, #tpu.memory_space<vmem>>, vector<8x16xf32>
      tpu.vector_store %arg7[%c0_14, %c0_15], %16 {strides = array<i32>} : memref<8x16xf32, #tpu.memory_space<vmem>>, vector<8x16xf32>,
      %cst_16 = arith.constant 0.000000e+00 : f32
      %18 = vector.broadcast %cst_16 : f32 to vector<8x16xf32>
      %c0_17 = arith.constant 0 : index
      %c0_18 = arith.constant 0 : index
      %19 = vector.load %arg8[%c0_17, %c0_18] : memref<8x16xf32, #tpu.memory_space<vmem>>, vector<8x16xf32>
      tpu.vector_store %arg8[%c0_17, %c0_18], %18 {strides = array<i32>} : memref<8x16xf32, #tpu.memory_space<vmem>>, vector<8x16xf32>,
      %c0_19 = arith.constant 0 : index
      %c0_20 = arith.constant 0 : index
      %20 = vector.load %arg2[%c0_19, %c0_20] : memref<8x16xf32, #tpu.memory_space<vmem>>, vector<8x16xf32>
      %cst_21 = arith.constant dense<0.000000e+00> : vector<8xf32>
      %21 = vector.multi_reduction <add>, %20, %cst_21 [1] : vector<8x16xf32> to vector<8xf32>
      %22 = vector.shape_cast %21 : vector<8xf32> to vector<8x1xf32>
      %cst_22 = arith.constant 1.600000e+01 : f32
      %23 = vector.broadcast %cst_22 : f32 to vector<8x1xf32>
      %24 = arith.divf %22, %23 : vector<8x1xf32>
      %25 = vector.shape_cast %24 : vector<8x1xf32> to vector<8x1xf32>
      %26 = vector.broadcast %25 : vector<8x1xf32> to vector<8x16xf32>
      %c0_23 = arith.constant 0 : index
      %c0_24 = arith.constant 0 : index
      %27 = vector.load %arg6[%c0_23, %c0_24] : memref<8x16xf32, #tpu.memory_space<vmem>>, vector<8x16xf32>
      tpu.vector_store %arg6[%c0_23, %c0_24], %26 {strides = array<i32>} : memref<8x16xf32, #tpu.memory_space<vmem>>, vector<8x16xf32>,
    } else {
    }
    %c0 = arith.constant 0 : index
    %c0_1 = arith.constant 0 : index
    %3 = vector.load %arg2[%c0, %c0_1] : memref<8x16xf32, #tpu.memory_space<vmem>>, vector<8x16xf32>
    %c0_2 = arith.constant 0 : index
    %c0_3 = arith.constant 0 : index
    %4 = vector.load %arg6[%c0_2, %c0_3] : memref<8x16xf32, #tpu.memory_space<vmem>>, vector<8x16xf32>
    %5 = arith.subf %3, %4 : vector<8x16xf32>
    %c0_4 = arith.constant 0 : index
    %c0_5 = arith.constant 0 : index
    %6 = vector.load %arg7[%c0_4, %c0_5] : memref<8x16xf32, #tpu.memory_space<vmem>>, vector<8x16xf32>
    %7 = arith.addf %6, %5 : vector<8x16xf32>
    %c0_6 = arith.constant 0 : index
    %c0_7 = arith.constant 0 : index
    %8 = vector.load %arg7[%c0_6, %c0_7] : memref<8x16xf32, #tpu.memory_space<vmem>>, vector<8x16xf32>
    tpu.vector_store %arg7[%c0_6, %c0_7], %7 {strides = array<i32>} : memref<8x16xf32, #tpu.memory_space<vmem>>, vector<8x16xf32>,
    %c0_8 = arith.constant 0 : index
    %c0_9 = arith.constant 0 : index
    %9 = vector.load %arg8[%c0_8, %c0_9] : memref<8x16xf32, #tpu.memory_space<vmem>>, vector<8x16xf32>
    %10 = arith.mulf %5, %5 : vector<8x16xf32>
    %11 = arith.addf %9, %10 : vector<8x16xf32>
    %c0_10 = arith.constant 0 : index
    %c0_11 = arith.constant 0 : index
    %12 = vector.load %arg8[%c0_10, %c0_11] : memref<8x16xf32, #tpu.memory_space<vmem>>, vector<8x16xf32>
    tpu.vector_store %arg8[%c0_10, %c0_11], %11 {strides = array<i32>} : memref<8x16xf32, #tpu.memory_space<vmem>>, vector<8x16xf32>,
    %c0_i32_12 = arith.constant 0 : i32
    %13 = arith.cmpi eq, %arg1, %c0_i32_12 : i32
    %14 = arith.extui %13 : i1 to i32
    %c0_i32_13 = arith.constant 0 : i32
    %15 = arith.cmpi ne, %14, %c0_i32_13 : i32
    scf.if %15 {
      %c0_14 = arith.constant 0 : index
      %c0_15 = arith.constant 0 : index
      %16 = vector.load %arg7[%c0_14, %c0_15] : memref<8x16xf32, #tpu.memory_space<vmem>>, vector<8x16xf32>
      %cst = arith.constant dense<0.000000e+00> : vector<8xf32>
      %17 = vector.multi_reduction <add>, %16, %cst [1] : vector<8x16xf32> to vector<8xf32>
      %18 = vector.shape_cast %17 : vector<8xf32> to vector<8x1xf32>
      %c0_16 = arith.constant 0 : index
      %c0_17 = arith.constant 0 : index
      %19 = vector.load %arg4[%c0_16, %c0_17] : memref<8x1xf32, #tpu.memory_space<vmem>>, vector<8x1xf32>
      tpu.vector_store %arg4[%c0_16, %c0_17], %18 {strides = array<i32>} : memref<8x1xf32, #tpu.memory_space<vmem>>, vector<8x1xf32>,
      %c0_18 = arith.constant 0 : index
      %c0_19 = arith.constant 0 : index
      %20 = vector.load %arg8[%c0_18, %c0_19] : memref<8x16xf32, #tpu.memory_space<vmem>>, vector<8x16xf32>
      %cst_20 = arith.constant dense<0.000000e+00> : vector<8xf32>
      %21 = vector.multi_reduction <add>, %20, %cst_20 [1] : vector<8x16xf32> to vector<8xf32>
      %22 = vector.shape_cast %21 : vector<8xf32> to vector<8x1xf32>
      %c0_21 = arith.constant 0 : index
      %c0_22 = arith.constant 0 : index
      %23 = vector.load %arg5[%c0_21, %c0_22] : memref<8x1xf32, #tpu.memory_space<vmem>>, vector<8x1xf32>
      tpu.vector_store %arg5[%c0_21, %c0_22], %22 {strides = array<i32>} : memref<8x1xf32, #tpu.memory_space<vmem>>, vector<8x1xf32>,
      %c0_23 = arith.constant 0 : index
      %c0_24 = arith.constant 0 : index
      %24 = vector.load %arg6[%c0_23, %c0_24] : memref<8x16xf32, #tpu.memory_space<vmem>>, vector<8x1xf32>
      %c0_25 = arith.constant 0 : index
      %c0_26 = arith.constant 0 : index
      %25 = vector.load %arg3[%c0_25, %c0_26] : memref<8x1xf32, #tpu.memory_space<vmem>>, vector<8x1xf32>
      tpu.vector_store %arg3[%c0_25, %c0_26], %24 {strides = array<i32>} : memref<8x1xf32, #tpu.memory_space<vmem>>, vector<8x1xf32>,
    } else {
    }
    return
  }
  func.func @transform_0(%arg0: i32, %arg1: i32) -> (i32, i32) {
    %c0_i32 = arith.constant 0 : i32
    return %arg0, %arg1 : i32, i32
  }
  func.func @transform_1(%arg0: i32, %arg1: i32) -> (i32, i32) {
    %c0_i32 = arith.constant 0 : i32
    %c0_i32_0 = arith.constant 0 : i32
    return %arg0, %c0_i32 : i32, i32
  }
  func.func @transform_2(%arg0: i32, %arg1: i32) -> (i32, i32) {
    %c0_i32 = arith.constant 0 : i32
    %c0_i32_0 = arith.constant 0 : i32
    return %arg0, %c0_i32 : i32, i32
  }
  func.func @transform_3(%arg0: i32, %arg1: i32) -> (i32, i32) {
    %c0_i32 = arith.constant 0 : i32
    %c0_i32_0 = arith.constant 0 : i32
    return %arg0, %c0_i32 : i32, i32
  }
}

</mosaic_0001>

<bundles_post_ra>
// kernel: statistic_pooling.1
= control target key start
LH: loop header
LB: loop body
LE: loop exit
PB: predicated region body
PF: predicated region fallthrough
CT: control target
= control target key end

     0   :  { %9 = vsyncpa [#allocation6], 0  ;;  %s101_s12 = smov [#allocation5]   ;;  %s146_s0 = inlined_call_operand.hbm [shape: f32[8,16], index: 0, kind: input, shape index: {}]   ;;  %s147_s1 = inlined_call_operand.vmem [shape: f32[8,1], index: 1, kind: output, shape index: {0}]   ;;  %s148_s2 = inlined_call_operand.vmem [shape: f32[8,1], index: 2, kind: output, shape index: {1}]   ;;  %s149_s3 = inlined_call_operand.vmem [shape: f32[8,1], index: 3, kind: output, shape index: {2}]  }
   0x1   :  { %s16_s13 = sshll.u32 %s101_s12, 4  ;;  %s17_s13 = int_to_ptr.vmem [resolvable:$true] %s16_s13 }
   0x2   :  { %s87_s14 = scalar_lea.vmem %s17_s13, 128  ;;  %p92_p1 = scmp.lt.s32.totalorder %s17_s13, %s17_s13 }
   0x3   :  { %p88_p0 = scmp.ne.s32.totalorder %s17_s13, %s87_s14  ;;  %p93_p2 = scmp.lt.s32.totalorder %s87_s14, %s87_s14 }
   0x5   :  { %p94_p3 = por %p93_p2, %p92_p1 }
   0x7   :  { %p95_p4 = pnand %p94_p3, %p88_p0 }
   0x9   :  { %98 = shalt.err (!%p95_p4)
}
   0xa   :  { %19 = dma.hbm_to_vmem [thread:$0]  %s146_s0, 128, %s17_s13, [#allocation6]  }
   0xb   :  { %99 = dma.done.wait [#allocation6], 128  }
   0xc   :  { %100 = vsyncadd [#allocation6], 4294967168  ;;  %vm27_vm0 = vcmask 130048   ;;  %v102_v0 = vmov 0.0   ;;  %v30_v1 = vld [vmem:[#allocation5] sm:$0xff]  ;;  %vm55_vm1 = vcmask 7168  }
   0xd   :  { %28 = vst.msk [vmem:[#allocation3] sm:$0xff] %vm27_vm0, %v102_v0  ;;  %29 = vst.msk [vmem:[#allocation4] sm:$0xff] %vm27_vm0, %v102_v0  ;;  %v31_v2 = vsel %vm27_vm0, %v30_v1, 0.0 }
   0xe   :  { %32 = vadd.xlane.f32.xlu0 %v31_v2 }
  0x14   :  { %v40_v6 = vld [vmem:[#allocation3] sm:$0xff]  ;;  %v44_v8 = vld [vmem:[#allocation4] sm:$0xff] }
  0x97   :  { %v33_v3 = vpop.xlane.xlu0 %32 }
  0x98   :  { %v35_v4 = vmul.f32 0.0625, %v33_v3 }
  0x9a   :  { %36 = vst.msk [vmem:[#allocation2] sm:$0xff] %vm27_vm0, %v35_v4 }
  0xa1   :  { %v38_v5 = vld [vmem:[#allocation2] sm:$0xff] }
  0xa2   :  { %v39_v7 = vsub.f32 %v30_v1, %v38_v5  ;;  %63 = vst.msk [vmem:[%s147_s1] sm:$0xff] %vm55_vm1, %v38_v5 }
  0xa4   :  { %v45_v9 = vmul.f32 %v39_v7, %v39_v7  ;;  %v41_v10 = vadd.f32 %v40_v6, %v39_v7 }
  0xa6   :  { %43 = vst.msk [vmem:[#allocation3] sm:$0xff] %vm27_vm0, %v41_v10  ;;  %v46_v11 = vadd.f32 %v45_v9, %v44_v8 }
  0xa8   :  { %47 = vst.msk [vmem:[#allocation4] sm:$0xff] %vm27_vm0, %v46_v11 }
  0xad   :  { %v51_v12 = vld [vmem:[#allocation3] sm:$0xff] }
  0xae   :  { %v52_v13 = vsel %vm27_vm0, %v51_v12, 0.0 }
  0xaf   :  { %53 = vadd.xlane.f32.xlu0 %v52_v13  ;;  %v57_v14 = vld [vmem:[#allocation4] sm:$0xff] }
  0xb0   :  { %v58_v15 = vsel %vm27_vm0, %v57_v14, 0.0 }
  0xb1   :  { %59 = vadd.xlane.f32.xlu1 %v58_v15 }
 0x138   :  { %v54_v16 = vpop.xlane.xlu0 %53 }
 0x139   :  { %56 = vst.msk [vmem:[%s148_s2] sm:$0xff] %vm55_vm1, %v54_v16 }
 0x13a   :  { %v60_v17 = vpop.xlane.xlu1 %59 }
 0x13b   :  { %61 = vst.msk [vmem:[%s149_s3] sm:$0xff] %vm55_vm1, %v60_v17 }
 0x13c   :  { %76 = vsyncpa [#allocation6], 1 }

</bundles_post_ra>
